<compile_context>
chip_gen: v7x
topology: tpu7x:2x2x1
jax: 0.10.0
libtpu: 0.0.40
codegen_flags: <defaults>
</compile_context>

<pallas_src>
import jax
import jax.numpy as jnp
from jax.experimental import pallas as pl
from jax.experimental.pallas import tpu as pltpu


# ----------------------------- Pallas kernel ---------------------------------
def _fused_gcn_stack_kernel(a_ref, xw0_ref, w_ref, b_ref, o_ref, h_ref):
    """One grid step == one GCN layer.

    a_ref   : (N, N)                  bf16  resident (Buffered(1), constant index)
    xw0_ref : (N, hidden)             bf16  X @ W1 precomputed by the wrapper, resident
    w_ref   : (L-1, hidden, hidden)   bf16  hidden + fused-final weights, resident
    b_ref   : (L, 1, hidden)          f32   per-layer biases, resident
    o_ref   : (N, hidden)             f32   output [mu | logstd], written at last layer
    h_ref   : (N, hidden)             bf16  VMEM scratch: current activation
    """
    layer = pl.program_id(0)
    num_layers = pl.num_programs(0)
    last = num_layers - 1

    # ---- layer 0 (conv1): aggregation over the resident adjacency; X @ W1 was done
    #      by XLA outside the kernel so the wide feature matrix never enters VMEM.
    @pl.when(layer == 0)
    def _():
        h = jnp.dot(a_ref[...], xw0_ref[...],
                    preferred_element_type=jnp.float32) + b_ref[0]
        h_ref[...] = jnp.maximum(h, 0.0).astype(h_ref.dtype)

    # ---- hidden layers (conv_n): relu, stash as next layer's input.
    @pl.when(jnp.logical_and(layer > 0, layer < last))
    def _():
        xw = jnp.dot(h_ref[...], w_ref[layer - 1],
                     preferred_element_type=jnp.float32)          # (N, hidden) f32
        h = jnp.dot(a_ref[...], xw.astype(jnp.bfloat16),
                    preferred_element_type=jnp.float32) + b_ref[layer]
        h_ref[...] = jnp.maximum(h, 0.0).astype(h_ref.dtype)

    # ---- final layer: fused [mu | logstd], no ReLU, single unconditional full write.
    @pl.when(layer == last)
    def _():
        xw = jnp.dot(h_ref[...], w_ref[layer - 1],
                     preferred_element_type=jnp.float32)
        h = jnp.dot(a_ref[...], xw.astype(jnp.bfloat16),
                    preferred_element_type=jnp.float32) + b_ref[layer]
        o_ref[...] = h.astype(o_ref.dtype)


def fused_gcn_forward(a_hat_bf16, xw0_bf16, w_stack_bf16, b_stack_f32):
    """Run all GCN layers in one pallas_call; returns (N, hidden) = [mu | logstd]."""
    n_nodes = a_hat_bf16.shape[0]
    hidden = xw0_bf16.shape[1]
    num_stack = w_stack_bf16.shape[0]          # n hidden layers + fused final layer
    num_layers = b_stack_f32.shape[0]          # = num_stack + 1 (layer 0 = conv1)
    assert num_layers == num_stack + 1

    # Explicit scoped-VMEM budget: everything is resident (single-buffered), so size the
    # limit from the actual footprint with headroom (lane dims pad up to 128 in VMEM).
    lane = max(hidden, 128)
    resident_bytes = (
        n_nodes * n_nodes * 2                  # A_hat, bf16
        + n_nodes * lane * 2                   # xw0, bf16
        + num_stack * hidden * lane * 2        # weight stack, bf16
        + num_layers * 8 * lane * 4            # bias stack, f32 (tile-padded)
        + n_nodes * lane * 4                   # output, f32
        + n_nodes * lane * 2                   # h scratch, bf16
    )
    vmem_limit = min(max(int(resident_bytes * 1.5) + (1 << 20), 8 << 20), 100 << 20)

    one_buf = pl.Buffered(1)   # constant-index blocks: double-buffering buys nothing
    in_specs = [
        pl.BlockSpec((n_nodes, n_nodes), lambda l: (0, 0), pipeline_mode=one_buf),
        pl.BlockSpec((n_nodes, hidden), lambda l: (0, 0), pipeline_mode=one_buf),
        pl.BlockSpec((num_stack, hidden, hidden), lambda l: (0, 0, 0),
                     pipeline_mode=one_buf),
        pl.BlockSpec((num_layers, 1, hidden), lambda l: (0, 0, 0),
                     pipeline_mode=one_buf),
    ]
    out_spec = pl.BlockSpec((n_nodes, hidden), lambda l: (0, 0), pipeline_mode=one_buf)

    return pl.pallas_call(
        _fused_gcn_stack_kernel,
        out_shape=jax.ShapeDtypeStruct((n_nodes, hidden), jnp.float32),
        grid_spec=pltpu.PrefetchScalarGridSpec(
            num_scalar_prefetch=0,
            grid=(num_layers,),
            in_specs=in_specs,
            out_specs=out_spec,
            scratch_shapes=[pltpu.VMEM((n_nodes, hidden), jnp.bfloat16)],
        ),
        compiler_params=pltpu.CompilerParams(
            dimension_semantics=("arbitrary",),   # layers are strictly sequential
            vmem_limit_bytes=vmem_limit,
        ),
    )(a_hat_bf16, xw0_bf16, w_stack_bf16, b_stack_f32)


# ----------------------------- Glue (plain JAX) -------------------------------
def build_norm_adj(edge_index, num_nodes, edge_weight=None):
    """Dense D^-1/2 (A + I) D^-1/2, matching PyG GCNConv normalization.

    Aggregation is over INCOMING edges (A[dst, src]), matching PyG's source->target
    message flow; identical to the outgoing orientation for symmetric edge_index.
    """
    src, dst = edge_index[0], edge_index[1]
    if edge_weight is None:
        edge_weight = jnp.ones(src.shape[0], dtype=jnp.float32)
    a = jnp.zeros((num_nodes, num_nodes), dtype=jnp.float32)
    a = a.at[dst, src].add(edge_weight)
    a = a + jnp.eye(num_nodes, dtype=jnp.float32)  # self loops (fill value 1.0)
    deg = a.sum(axis=1)
    d_inv_sqrt = jnp.where(deg > 0, 1.0 / jnp.sqrt(deg), 0.0)
    return d_inv_sqrt[:, None] * a * d_inv_sqrt[None, :]


class VariationalGCNEncoderPallas:
    """JAX/Pallas port of VariationalGCNEncoder (deterministic synthetic params)."""

    def __init__(self, in_channels, out_channels, n=0, *, key):
        self.n = n
        self.in_channels = in_channels
        self.out_channels = out_channels
        hidden = 2 * out_channels
        self.hidden = hidden

        def glorot(k, shape):
            fan_in, fan_out = shape
            limit = jnp.sqrt(6.0 / (fan_in + fan_out))
            return jax.random.uniform(k, shape, jnp.float32, -limit, limit)

        keys = jax.random.split(key, 3 + n)
        w1 = glorot(keys[0], (in_channels, hidden))
        b1 = jnp.zeros((hidden,), jnp.float32)
        wn = [glorot(keys[3 + i], (hidden, hidden)) for i in range(n)]
        bn = [jnp.zeros((hidden,), jnp.float32) for _ in range(n)]
        w_mu = glorot(keys[1], (hidden, out_channels))
        w_ls = glorot(keys[2], (hidden, out_channels))
        b_mu = jnp.zeros((out_channels,), jnp.float32)
        b_ls = jnp.zeros((out_channels,), jnp.float32)

        # conv_mu / conv_logstd fused into one final layer: W_last = [W_mu | W_ls].
        w_last = jnp.concatenate([w_mu, w_ls], axis=1)            # (hidden, hidden)
        b_last = jnp.concatenate([b_mu, b_ls], axis=0)            # (hidden,)

        # f32 master copies (layer-0 wrapper matmul + pure-JAX reference).
        self.w1_f32 = w1                                           # (in, hidden)
        self.w_stack_f32 = jnp.stack(wn + [w_last], axis=0)        # (n+1, hidden, hidden)
        self.b_stack = jnp.stack([b1] + bn + [b_last], axis=0)[:, None, :]  # (n+2,1,hidden)

        # bf16 copy kept resident inside the kernel (no in-kernel casts of weights).
        self.w_stack_bf16 = self.w_stack_f32.astype(jnp.bfloat16)

    def prepare_adjacency(self, edge_index, num_nodes, edge_weight=None):
        """Build (and let callers cache) the bf16 normalized adjacency."""
        return build_norm_adj(edge_index, num_nodes, edge_weight).astype(jnp.bfloat16)

    def __call__(self, x, edge_index, edge_weight=None, a_hat=None):
        num_nodes = x.shape[0]
        if a_hat is None:
            a_hat = self.prepare_adjacency(edge_index, num_nodes, edge_weight)
        a_hat = a_hat.astype(jnp.bfloat16)
        # Layer-0 feature transform X @ W1 outside the kernel: the (possibly wide) node
        # feature matrix never needs to be resident in kernel VMEM.
        xw0 = jnp.dot(x.astype(jnp.float32), self.w1_f32).astype(jnp.bfloat16)
        out = fused_gcn_forward(a_hat, xw0, self.w_stack_bf16, self.b_stack)
        mu = out[:, : self.out_channels]
        logstd = out[:, self.out_channels:]
        return mu, logstd

    def reference_forward(self, x, a_hat_f32):
        """Pure-JAX f32 reference mirroring the PyTorch forward (for tolerance check)."""
        h = jnp.maximum(a_hat_f32 @ (x @ self.w1_f32) + self.b_stack[0, 0], 0.0)
        for i in range(self.n):
            h = jnp.maximum(a_hat_f32 @ (h @ self.w_stack_f32[i]) + self.b_stack[i + 1, 0],
                            0.0)
        out = a_hat_f32 @ (h @ self.w_stack_f32[-1]) + self.b_stack[-1, 0]
        return out[:, : self.out_channels], out[:, self.out_channels:]


# ----------------------------------- main -------------------------------------
if __name__ == "__main__":
    key = jax.random.PRNGKey(0)
    k_x, k_e, k_w, k_p = jax.random.split(key, 4)

    num_nodes = 128        # N
    in_channels = 32
    out_channels = 16      # matches the script's `out_channels = 16`
    n_extra = 1            # exercise the conv_n loop
    num_edges = 256

    # Deterministic synthetic graph + features.
    x = jax.random.normal(k_x, (num_nodes, in_channels), dtype=jnp.float32)
    edge_index = jax.random.randint(k_e, (2, num_edges), 0, num_nodes, dtype=jnp.int32)
    edge_weight = jax.random.uniform(k_w, (num_edges,), jnp.float32, 0.5, 1.5)

    model = VariationalGCNEncoderPallas(in_channels, out_channels, n=n_extra, key=k_p)

    # A_hat depends only on the graph: build once (f32 for the reference, bf16 cached
    # for the kernel) and reuse across forward calls.
    a_hat_f32 = build_norm_adj(edge_index, num_nodes, edge_weight)
    a_hat = a_hat_f32.astype(jnp.bfloat16)

    mu, logstd = model(x, edge_index, edge_weight, a_hat=a_hat)
    jax.block_until_ready((mu, logstd))

    # Correctness vs. f32 pure-JAX reference (bf16 adjacency/activations => loose tol).
    mu_ref, logstd_ref = model.reference_forward(x, a_hat_f32)

    assert mu.shape == (num_nodes, out_channels)
    assert logstd.shape == (num_nodes, out_channels)
    assert bool(jnp.all(jnp.isfinite(mu))) and bool(jnp.all(jnp.isfinite(logstd)))
    assert bool(jnp.allclose(mu, mu_ref, atol=1e-1, rtol=1e-1))
    assert bool(jnp.allclose(logstd, logstd_ref, atol=1e-1, rtol=1e-1))
    print("KERNEL_OK")
</pallas_src>

<mosaic_0001>
module attributes {stable_mosaic.version = 11 : i64} {
  func.func @_fused_gcn_stack_kernel(%arg0: i32, %arg1: memref<128x128xbf16, #tpu.memory_space<vmem>>, %arg2: memref<128x32xbf16, #tpu.memory_space<vmem>>, %arg3: memref<2x32x32xbf16, #tpu.memory_space<vmem>>, %arg4: memref<3x1x32xf32, #tpu.memory_space<vmem>>, %arg5: memref<128x32xf32, #tpu.memory_space<vmem>>, %arg6: memref<128x32xbf16, #tpu.memory_space<vmem>>) attributes {dimension_semantics = [#tpu.dimension_semantics<arbitrary>], iteration_bounds = array<i64: 3>, scalar_prefetch = 0 : i64, scratch_operands = 1 : i64, tpu.core_type = #tpu.core_type<tc>, window_params = [{pipeline_mode = #tpu.pipeline_mode<synchronous>, transform_indices = @transform_0, window_bounds = array<i64: 128, 128>}, {pipeline_mode = #tpu.pipeline_mode<synchronous>, transform_indices = @transform_1, window_bounds = array<i64: 128, 32>}, {pipeline_mode = #tpu.pipeline_mode<synchronous>, transform_indices = @transform_2, window_bounds = array<i64: 2, 32, 32>}, {pipeline_mode = #tpu.pipeline_mode<synchronous>, transform_indices = @transform_3, window_bounds = array<i64: 3, 1, 32>}, {pipeline_mode = #tpu.pipeline_mode<synchronous>, transform_indices = @transform_4, window_bounds = array<i64: 128, 32>}]} {
    %c0_i32 = arith.constant 0 : i32
    %0 = arith.cmpi eq, %arg0, %c0_i32 : i32
    %1 = arith.extui %0 : i1 to i32
    %c0_i32_0 = arith.constant 0 : i32
    %2 = arith.cmpi ne, %1, %c0_i32_0 : i32
    scf.if %2 {
      %c0 = arith.constant 0 : index
      %c0_5 = arith.constant 0 : index
      %11 = vector.load %arg1[%c0, %c0_5] : memref<128x128xbf16, #tpu.memory_space<vmem>>, vector<128x128xbf16>
      %c0_6 = arith.constant 0 : index
      %c0_7 = arith.constant 0 : index
      %12 = vector.load %arg2[%c0_6, %c0_7] : memref<128x32xbf16, #tpu.memory_space<vmem>>, vector<128x32xbf16>
      %cst = arith.constant dense<0.000000e+00> : vector<128x32xf32>
      %13 = tpu.matmul %11, %12, %cst {dimension_numbers = #tpu.dot_dimension_numbers<[1], [0], [0], [1], [0, 0, 1, 1], [], []>} : vector<128x128xbf16>, vector<128x32xbf16>, vector<128x32xf32> -> vector<128x32xf32>
      %c0_8 = arith.constant 0 : index
      %c0_9 = arith.constant 0 : index
      %c0_10 = arith.constant 0 : index
      %14 = vector.load %arg4[%c0_8, %c0_9, %c0_10] : memref<3x1x32xf32, #tpu.memory_space<vmem>>, vector<1x1x32xf32>
      %15 = vector.shape_cast %14 : vector<1x1x32xf32> to vector<1x32xf32>
      %16 = vector.broadcast %15 : vector<1x32xf32> to vector<128x32xf32>
      %17 = arith.addf %13, %16 : vector<128x32xf32>
      %cst_11 = arith.constant 0.000000e+00 : f32
      %18 = vector.broadcast %cst_11 : f32 to vector<128x32xf32>
      %19 = arith.maximumf %17, %18 : vector<128x32xf32>
      %20 = arith.truncf %19 : vector<128x32xf32> to vector<128x32xbf16>
      %c0_12 = arith.constant 0 : index
      %c0_13 = arith.constant 0 : index
      %21 = vector.load %arg6[%c0_12, %c0_13] : memref<128x32xbf16, #tpu.memory_space<vmem>>, vector<128x32xbf16>
      tpu.vector_store %arg6[%c0_12, %c0_13], %20 {strides = array<i32>} : memref<128x32xbf16, #tpu.memory_space<vmem>>, vector<128x32xbf16>,
    } else {
    }
    %c0_i32_1 = arith.constant 0 : i32
    %3 = arith.cmpi sgt, %arg0, %c0_i32_1 : i32
    %c2_i32 = arith.constant 2 : i32
    %4 = arith.cmpi slt, %arg0, %c2_i32 : i32
    %5 = arith.andi %3, %4 : i1
    %6 = arith.extui %5 : i1 to i32
    %c0_i32_2 = arith.constant 0 : i32
    %7 = arith.cmpi ne, %6, %c0_i32_2 : i32
    scf.if %7 {
      %c0 = arith.constant 0 : index
      %c0_5 = arith.constant 0 : index
      %11 = vector.load %arg6[%c0, %c0_5] : memref<128x32xbf16, #tpu.memory_space<vmem>>, vector<128x32xbf16>
      %c1_i32 = arith.constant 1 : i32
      %12 = arith.subi %arg0, %c1_i32 : i32
      %13 = arith.index_cast %12 : i32 to index
      %c0_6 = arith.constant 0 : index
      %c0_7 = arith.constant 0 : index
      %14 = vector.load %arg3[%13, %c0_6, %c0_7] : memref<2x32x32xbf16, #tpu.memory_space<vmem>>, vector<1x32x32xbf16>
      %15 = vector.shape_cast %14 : vector<1x32x32xbf16> to vector<32x32xbf16>
      %cst = arith.constant dense<0.000000e+00> : vector<128x32xf32>
      %16 = tpu.matmul %11, %15, %cst {dimension_numbers = #tpu.dot_dimension_numbers<[1], [0], [0], [1], [0, 0, 1, 1], [], []>} : vector<128x32xbf16>, vector<32x32xbf16>, vector<128x32xf32> -> vector<128x32xf32>
      %c0_8 = arith.constant 0 : index
      %c0_9 = arith.constant 0 : index
      %17 = vector.load %arg1[%c0_8, %c0_9] : memref<128x128xbf16, #tpu.memory_space<vmem>>, vector<128x128xbf16>
      %18 = arith.truncf %16 : vector<128x32xf32> to vector<128x32xbf16>
      %cst_10 = arith.constant dense<0.000000e+00> : vector<128x32xf32>
      %19 = tpu.matmul %17, %18, %cst_10 {dimension_numbers = #tpu.dot_dimension_numbers<[1], [0], [0], [1], [0, 0, 1, 1], [], []>} : vector<128x128xbf16>, vector<128x32xbf16>, vector<128x32xf32> -> vector<128x32xf32>
      %20 = arith.index_cast %arg0 : i32 to index
      %c0_11 = arith.constant 0 : index
      %c0_12 = arith.constant 0 : index
      %21 = vector.load %arg4[%20, %c0_11, %c0_12] : memref<3x1x32xf32, #tpu.memory_space<vmem>>, vector<1x1x32xf32>
      %22 = vector.shape_cast %21 : vector<1x1x32xf32> to vector<1x32xf32>
      %23 = vector.broadcast %22 : vector<1x32xf32> to vector<128x32xf32>
      %24 = arith.addf %19, %23 : vector<128x32xf32>
      %cst_13 = arith.constant 0.000000e+00 : f32
      %25 = vector.broadcast %cst_13 : f32 to vector<128x32xf32>
      %26 = arith.maximumf %24, %25 : vector<128x32xf32>
      %27 = arith.truncf %26 : vector<128x32xf32> to vector<128x32xbf16>
      %c0_14 = arith.constant 0 : index
      %c0_15 = arith.constant 0 : index
      %28 = vector.load %arg6[%c0_14, %c0_15] : memref<128x32xbf16, #tpu.memory_space<vmem>>, vector<128x32xbf16>
      tpu.vector_store %arg6[%c0_14, %c0_15], %27 {strides = array<i32>} : memref<128x32xbf16, #tpu.memory_space<vmem>>, vector<128x32xbf16>,
    } else {
    }
    %c2_i32_3 = arith.constant 2 : i32
    %8 = arith.cmpi eq, %arg0, %c2_i32_3 : i32
    %9 = arith.extui %8 : i1 to i32
    %c0_i32_4 = arith.constant 0 : i32
    %10 = arith.cmpi ne, %9, %c0_i32_4 : i32
    scf.if %10 {
      %c0 = arith.constant 0 : index
      %c0_5 = arith.constant 0 : index
      %11 = vector.load %arg6[%c0, %c0_5] : memref<128x32xbf16, #tpu.memory_space<vmem>>, vector<128x32xbf16>
      %c1_i32 = arith.constant 1 : i32
      %12 = arith.subi %arg0, %c1_i32 : i32
      %13 = arith.index_cast %12 : i32 to index
      %c0_6 = arith.constant 0 : index
      %c0_7 = arith.constant 0 : index
      %14 = vector.load %arg3[%13, %c0_6, %c0_7] : memref<2x32x32xbf16, #tpu.memory_space<vmem>>, vector<1x32x32xbf16>
      %15 = vector.shape_cast %14 : vector<1x32x32xbf16> to vector<32x32xbf16>
      %cst = arith.constant dense<0.000000e+00> : vector<128x32xf32>
      %16 = tpu.matmul %11, %15, %cst {dimension_numbers = #tpu.dot_dimension_numbers<[1], [0], [0], [1], [0, 0, 1, 1], [], []>} : vector<128x32xbf16>, vector<32x32xbf16>, vector<128x32xf32> -> vector<128x32xf32>
      %c0_8 = arith.constant 0 : index
      %c0_9 = arith.constant 0 : index
      %17 = vector.load %arg1[%c0_8, %c0_9] : memref<128x128xbf16, #tpu.memory_space<vmem>>, vector<128x128xbf16>
      %18 = arith.truncf %16 : vector<128x32xf32> to vector<128x32xbf16>
      %cst_10 = arith.constant dense<0.000000e+00> : vector<128x32xf32>
      %19 = tpu.matmul %17, %18, %cst_10 {dimension_numbers = #tpu.dot_dimension_numbers<[1], [0], [0], [1], [0, 0, 1, 1], [], []>} : vector<128x128xbf16>, vector<128x32xbf16>, vector<128x32xf32> -> vector<128x32xf32>
      %20 = arith.index_cast %arg0 : i32 to index
      %c0_11 = arith.constant 0 : index
      %c0_12 = arith.constant 0 : index
      %21 = vector.load %arg4[%20, %c0_11, %c0_12] : memref<3x1x32xf32, #tpu.memory_space<vmem>>, vector<1x1x32xf32>
      %22 = vector.shape_cast %21 : vector<1x1x32xf32> to vector<1x32xf32>
      %23 = vector.broadcast %22 : vector<1x32xf32> to vector<128x32xf32>
      %24 = arith.addf %19, %23 : vector<128x32xf32>
      %c0_13 = arith.constant 0 : index
      %c0_14 = arith.constant 0 : index
      %25 = vector.load %arg5[%c0_13, %c0_14] : memref<128x32xf32, #tpu.memory_space<vmem>>, vector<128x32xf32>
      tpu.vector_store %arg5[%c0_13, %c0_14], %24 {strides = array<i32>} : memref<128x32xf32, #tpu.memory_space<vmem>>, vector<128x32xf32>,
    } else {
    }
    return
  }
  func.func @transform_0(%arg0: i32) -> (i32, i32) {
    %c0_i32 = arith.constant 0 : i32
    %c0_i32_0 = arith.constant 0 : i32
    %c0_i32_1 = arith.constant 0 : i32
    return %c0_i32, %c0_i32_0 : i32, i32
  }
  func.func @transform_1(%arg0: i32) -> (i32, i32) {
    %c0_i32 = arith.constant 0 : i32
    %c0_i32_0 = arith.constant 0 : i32
    %c0_i32_1 = arith.constant 0 : i32
    return %c0_i32, %c0_i32_0 : i32, i32
  }
  func.func @transform_2(%arg0: i32) -> (i32, i32, i32) {
    %c0_i32 = arith.constant 0 : i32
    %c0_i32_0 = arith.constant 0 : i32
    %c0_i32_1 = arith.constant 0 : i32
    %c0_i32_2 = arith.constant 0 : i32
    return %c0_i32, %c0_i32_0, %c0_i32_1 : i32, i32, i32
  }
  func.func @transform_3(%arg0: i32) -> (i32, i32, i32) {
    %c0_i32 = arith.constant 0 : i32
    %c0_i32_0 = arith.constant 0 : i32
    %c0_i32_1 = arith.constant 0 : i32
    %c0_i32_2 = arith.constant 0 : i32
    return %c0_i32, %c0_i32_0, %c0_i32_1 : i32, i32, i32
  }
  func.func @transform_4(%arg0: i32) -> (i32, i32) {
    %c0_i32 = arith.constant 0 : i32
    %c0_i32_0 = arith.constant 0 : i32
    %c0_i32_1 = arith.constant 0 : i32
    return %c0_i32, %c0_i32_0 : i32, i32
  }
}

</mosaic_0001>

<bundles_post_ra>
// kernel: tpu_custom_call.1
= control target key start
LH: loop header
LB: loop body
LE: loop exit
PB: predicated region body
PF: predicated region fallthrough
CT: control target
= control target key end

     0   :  { %9 = vsyncpa [#allocation4], 0  ;;  %s1643_s15 = smov 0   ;;  %s1902_s0 = inlined_call_operand.vmem [shape: bf16[128,128], index: 0, kind: input, shape index: {}]   ;;  %s1903_s1 = inlined_call_operand.vmem [shape: bf16[128,32], index: 1, kind: input, shape index: {}]   ;;  %s1904_s2 = inlined_call_operand.hbm [shape: bf16[2,32,32], index: 2, kind: input, shape index: {}]   ;;  %s1905_s3 = inlined_call_operand.vmem [shape: f32[3,1,32], index: 3, kind: input, shape index: {}]   ;;  %s1906_s4 = inlined_call_operand.vmem [shape: f32[128,32], index: 4, kind: output, shape index: {}]  }
   0x1 LB: > { %s1649_s16 = sadd.s32 4294967295, %s1613_s15   ;;  %p1195_p0 = scmp.ge.s32.totalorder %s1613_s15, 1  ;;  %s1613_s15 = sphi %s1643_s15, %s15_s15  }
   0x2   : > { %p125_p1 = scmp.lt.s32.totalorder %s1613_s15, 4  ;;  %s1615_s17 = smov [#allocation3]  }
   0x3   : > { %s143_s18 = sshll.u32 %s1615_s17, 4  ;;  %p1907_p4 = scmp.eq.s32.totalorder %s1649_s16, 0  ;;  %s144_s18 = int_to_ptr.vmem [resolvable:$true] %s143_s18 }
   0x4   : > { %p1654_p3 = pnand %p1195_p0, %p125_p1  ;;  %s1575_s23 = scalar_lea.hbm %s1904_s2, 512 }
   0x5   : > { %p1576_p7 = scmp.ne.s32.totalorder %s1904_s2, %s1575_s23  ;;  %p1582_p11 = scmp.lt.u32.totalorder %s1575_s23, %s1904_s2 }
   0x6   : > { %s1909_s19 = scalar_select %p1654_p3, 1, 0 }
   0x7   : > { %p1522_p5 = pneg %p1654_p3 }
   0x9   : > { %p1663_p6 = pnand %p1907_p4, %p1522_p5 }
   0xb   : > { %p1577_p8 = pneg %p1663_p6 }
   0xd   : > { %p1578_p9 = pnand %p1577_p8, %p1576_p7 }
   0xf   : > { %p1579_p10 = pneg %p1578_p9 }
  0x11   : > { %p1584_p12 = pnand %p1582_p11, %p1579_p10 }
  0x13   : > { %1587 = shalt.err (!%p1584_p12)
}
  0x14   : > { %s1588_s28 = scalar_lea.vmem %s144_s18, 512  ;;  %p1596_p5 = scmp.lt.s32.totalorder %s144_s18, %s144_s18 }
  0x15   : > { %p1589_p13 = scmp.ne.s32.totalorder %s144_s18, %s1588_s28  ;;  %p1597_p2 = scmp.lt.s32.totalorder %s1588_s28, %s1588_s28 }
  0x17   : > { %p1591_p0 = pnand %p1589_p13, %p1577_p8  ;;  %p1598_p4 = por %p1597_p2, %p1596_p5 }
  0x19   : > { %p1592_p1 = pneg %p1591_p0 }
  0x1b   : > { %p1599_p3 = pnand %p1598_p4, %p1592_p1 }
  0x1d   : > { %1602 = shalt.err (!%p1599_p3)
}
  0x1e   : > { %s1616_s29 = smov 64   ;;  %s1617_s30 = smov 4  }
  0x1f   : > { %1525 = dma.hbm_to_vmem [thread:$0]  (!%p1663_p6), %s1904_s2, 512, %s144_s18, [#allocation4], %s1616_s29, %s1616_s29, %s1617_s30  }
  0x20   : > { %p1911_p7 = scmp.ne.s32.totalorder %s1909_s19, 0 }
  0x21   : > { %p1912_p9 = scmp.eq.s32.totalorder (!%p1911_p7), %s1649_s16, 0 }
  0x22   : > { %162 = sbr.rel (%p1911_p7) target bundleno = 1304 (0x518), region = 36 }
  0x29   : > { %1608 = dma.done.wait (%p1912_p9), [#allocation4], 512   ;;  %p1913_p8 = pmov %p1912_p9 }
  0x2a   : > { %p1914_p2 = scmp.ne.s32.totalorder %s1649_s16, 0 }
  0x2b   : > { %1610 = vsyncadd (%p1913_p8), [#allocation4], 4294966784  ;;  %v1539_v0 = vld [vmem:[%s1903_s1] sm:$0xff] (!%p1914_p2)   ;;  %v1540_v1 = vld [vmem:[%s1903_s1 + $0x8] sm:$0xff] (!%p1914_p2)   ;;  %vm439_vm0 = vcmask (!%p1914_p2), 261120  }
  0x2c   : > { %182 = sbr.rel (%p1914_p2) target bundleno = 306 (0x132), region = 44  ;;  %1334 = vmatprep.subr.bf16.mxu0 (!%p1914_p2), %v1539_v0  ;;  %1470 = vmatprep.subr.bf16.mxu1 (!%p1914_p2), %v1539_v0  ;;  %v1541_v2 = vld [vmem:[%s1903_s1 + $0x10] sm:$0xff] (!%p1914_p2)   ;;  %v1542_v3 = vld [vmem:[%s1903_s1 + $0x18] sm:$0xff] (!%p1914_p2)   ;;  %v1547_v4 = vld [vmem:[%s1902_s0] sm:$0xff] (!%p1914_p2)  }
  0x2d   : > { %1335 = vmatpush3.bf16.msra.mxu0 (!%p1914_p2), %v1539_v0  ;;  %1478 = vmatpush3.bf16.msra.mxu1 (!%p1914_p2), %v1539_v0  ;;  %v1548_v5 = vld [vmem:[%s1902_s0 + $0x20] sm:$0xff] (!%p1914_p2)   ;;  %v1544_v7 = vld [vmem:[%s1903_s1 + $0x28] sm:$0xff] (!%p1914_p2)   ;;  %v1545_v8 = vld [vmem:[%s1903_s1 + $0x30] sm:$0xff] (!%p1914_p2)  }
  0x2e   : > { %1336 = vmatprep.subr.bf16.mxu0 (!%p1914_p2), %v1540_v1  ;;  %1471 = vmatprep.subr.bf16.mxu1 (!%p1914_p2), %v1540_v1  ;;  %v1543_v6 = vld [vmem:[%s1903_s1 + $0x20] sm:$0xff] (!%p1914_p2)   ;;  %v1546_v9 = vld [vmem:[%s1903_s1 + $0x38] sm:$0xff] (!%p1914_p2)   ;;  %v1549_v10 = vld [vmem:[%s1902_s0 + $0x8] sm:$0xff] (!%p1914_p2)  }
  0x2f   : > { %1350 = vmatprep.mubr.bf16.mxu0 (!%p1914_p2), %v1547_v4  ;;  %1358 = vmatprep.mubr.bf16.mxu1 (!%p1914_p2), %v1548_v5  ;;  %v1550_v11 = vld [vmem:[%s1902_s0 + $0x28] sm:$0xff] (!%p1914_p2)   ;;  %v1551_v12 = vld [vmem:[%s1902_s0 + $0x10] sm:$0xff] (!%p1914_p2)   ;;  %v1553_v14 = vld [vmem:[%s1902_s0 + $0x18] sm:$0xff] (!%p1914_p2)  }
  0x30   : > { %v1552_v13 = vld [vmem:[%s1902_s0 + $0x30] sm:$0xff] (!%p1914_p2)   ;;  %v1554_v15 = vld [vmem:[%s1902_s0 + $0x38] sm:$0xff] (!%p1914_p2)   ;;  %v1200_v16 = vld [vmem:[%s1905_s3] ss:$0 sm:$0xff] (!%p1914_p2) }
  0x31   : > { %1337 = vmatpush3.bf16.msra.mxu0 (!%p1914_p2), %v1540_v1  ;;  %1479 = vmatpush3.bf16.msra.mxu1 (!%p1914_p2), %v1540_v1 }
  0x32   : > { %1338 = vmatprep.subr.bf16.mxu0 (!%p1914_p2), %v1541_v2  ;;  %1472 = vmatprep.subr.bf16.mxu1 (!%p1914_p2), %v1541_v2 }
  0x35   : > { %1339 = vmatpush3.bf16.msra.mxu0 %v1541_v2  ;;  %1480 = vmatpush3.bf16.msra.mxu1 %v1541_v2 }
  0x36   : > { %1340 = vmatprep.subr.bf16.mxu0 %v1542_v3  ;;  %1473 = vmatprep.subr.bf16.mxu1 %v1542_v3 }
  0x39   : > { %1341 = vmatpush3.bf16.msra.mxu0 %v1542_v3  ;;  %1481 = vmatpush3.bf16.msra.mxu1 %v1542_v3 }
  0x3a   : > { %1342 = vmatprep.subr.bf16.mxu0 %v1543_v6  ;;  %1474 = vmatprep.subr.bf16.mxu1 %v1543_v6 }
  0x3d   : > { %1343 = vmatpush3.bf16.msra.mxu0 %v1543_v6  ;;  %1482 = vmatpush3.bf16.msra.mxu1 %v1543_v6 }
  0x3e   : > { %1344 = vmatprep.subr.bf16.mxu0 %v1544_v7  ;;  %1475 = vmatprep.subr.bf16.mxu1 %v1544_v7 }
  0x41   : > { %1345 = vmatpush3.bf16.msra.mxu0 %v1544_v7  ;;  %1483 = vmatpush3.bf16.msra.mxu1 %v1544_v7 }
  0x42   : > { %1346 = vmatprep.subr.bf16.mxu0 %v1545_v8  ;;  %1476 = vmatprep.subr.bf16.mxu1 %v1545_v8 }
  0x45   : > { %1347 = vmatpush3.bf16.msra.mxu0 %v1545_v8  ;;  %1484 = vmatpush3.bf16.msra.mxu1 %v1545_v8 }
  0x46   : > { %1348 = vmatprep.subr.bf16.mxu0 %v1546_v9  ;;  %1477 = vmatprep.subr.bf16.mxu1 %v1546_v9 }
  0x49   : > { %1349 = vmatpush3.bf16.msra.mxu0 %v1546_v9  ;;  %1485 = vmatpush3.bf16.msra.mxu1 %v1546_v9 }
  0x4c   : > { %1351 = vmatmul.mubr.bf16.vlgmr.msra.gmra.mrb[0].mxu0 %v1549_v10  ;;  %1359 = vmatmul.mubr.bf16.vlgmr.msra.gmra.mrb[0].mxu1 %v1550_v11 }
  0x4d   : > { %1354 = vmatprep.mubr.bf16.mxu0 %v1551_v12  ;;  %1362 = vmatprep.mubr.bf16.mxu1 %v1552_v13 }
  0x54   : > { %1355 = vmatmul.mubr.bf16.gmra.mrb[4].mxu0 %v1553_v14  ;;  %1363 = vmatmul.mubr.bf16.gmra.mrb[4].mxu1 %v1554_v15 }
 0x11f   : > { %v1352_v17 = vpop.f32.mrb[0].mxu0  ;;  %v1360_v18 = vpop.f32.mrb[0].mxu1 }
 0x120   : > { %v361_v19 = vadd.f32 %v1352_v17, %v1200_v16  ;;  %v393_v20 = vadd.f32 %v1360_v18, %v1200_v16  ;;  %v352_v21 = vpop.f32.mrb[1].mxu0  ;;  %v384_v22 = vpop.f32.mrb[1].mxu1 }
 0x121   : > { %v353_v23 = vadd.f32 %v1200_v16, %v352_v21  ;;  %v385_v24 = vadd.f32 %v1200_v16, %v384_v22  ;;  %v1353_v25 = vpop.f32.mrb[2].mxu0  ;;  %v1361_v26 = vpop.f32.mrb[2].mxu1 }
 0x122   : > { %v364_v27 = vadd.f32 %v1353_v25, %v1200_v16  ;;  %v396_v28 = vadd.f32 %v1361_v26, %v1200_v16  ;;  %v355_v29 = vpop.f32.mrb[3].mxu0  ;;  %v387_v30 = vpop.f32.mrb[3].mxu1  ;;  %v417_v33 = vmax.f32 %v361_v19, 0.0  ;;  %v425_v34 = vmax.f32 %v393_v20, 0.0 }
 0x123   : > { %v356_v31 = vadd.f32 %v1200_v16, %v355_v29  ;;  %v388_v32 = vadd.f32 %v1200_v16, %v387_v30  ;;  %v415_v37 = vmax.f32 %v353_v23, 0.0  ;;  %v423_v38 = vmax.f32 %v385_v24, 0.0 }
 0x124   : > { %v418_v35 = vmax.f32 %v364_v27, 0.0  ;;  %v426_v36 = vmax.f32 %v396_v28, 0.0 }
 0x125   : > { %v416_v39 = vmax.f32 %v356_v31, 0.0  ;;  %v424_v40 = vmax.f32 %v388_v32, 0.0 }
 0x126   : > { %v432_v41 = vpack.c.bf16 %v418_v35, %v417_v33  ;;  %v436_v42 = vpack.c.bf16 %v426_v36, %v425_v34 }
 0x127   : > { %v431_v43 = vpack.c.bf16 %v416_v39, %v415_v37  ;;  %v435_v44 = vpack.c.bf16 %v424_v40, %v423_v38  ;;  %v1356_v45 = vpop.f32.mrb[4].mxu0  ;;  %v1364_v46 = vpop.f32.mrb[4].mxu1 }
 0x128   : > { %441 = vst.msk [vmem:[#allocation2 + $0x8] sm:$0xff] %vm439_vm0, %v432_v41  ;;  %445 = vst.msk [vmem:[#allocation2 + $0x28] sm:$0xff] %vm439_vm0, %v436_v42  ;;  %v377_v47 = vadd.f32 %v1356_v45, %v1200_v16  ;;  %v409_v48 = vadd.f32 %v1364_v46, %v1200_v16  ;;  %v368_v49 = vpop.f32.mrb[5].mxu0  ;;  %v400_v50 = vpop.f32.mrb[5].mxu1 }
 0x129   : > { %440 = vst.msk [vmem:[#allocation2] sm:$0xff] %vm439_vm0, %v431_v43  ;;  %444 = vst.msk [vmem:[#allocation2 + $0x20] sm:$0xff] %vm439_vm0, %v435_v44  ;;  %v369_v51 = vadd.f32 %v1200_v16, %v368_v49  ;;  %v401_v52 = vadd.f32 %v1200_v16, %v400_v50  ;;  %v1357_v53 = vpop.f32.mrb[6].mxu0  ;;  %v1365_v54 = vpop.f32.mrb[6].mxu1 }
 0x12a   : > { %v380_v55 = vadd.f32 %v1357_v53, %v1200_v16  ;;  %v412_v56 = vadd.f32 %v1365_v54, %v1200_v16  ;;  %v371_v57 = vpop.f32.mrb[7].mxu0  ;;  %v403_v58 = vpop.f32.mrb[7].mxu1  ;;  %v421_v61 = vmax.f32 %v377_v47, 0.0  ;;  %v429_v62 = vmax.f32 %v409_v48, 0.0 }
 0x12b   : > { %v372_v59 = vadd.f32 %v1200_v16, %v371_v57  ;;  %v404_v60 = vadd.f32 %v1200_v16, %v403_v58  ;;  %v419_v1 = vmax.f32 %v369_v51, 0.0  ;;  %v427_v2 = vmax.f32 %v401_v52, 0.0 }
 0x12c   : > { %v422_v63 = vmax.f32 %v380_v55, 0.0  ;;  %v430_v0 = vmax.f32 %v412_v56, 0.0 }
 0x12d   : > { %v420_v3 = vmax.f32 %v372_v59, 0.0  ;;  %v428_v4 = vmax.f32 %v404_v60, 0.0 }
 0x12e   : > { %v434_v5 = vpack.c.bf16 %v422_v63, %v421_v61  ;;  %v438_v6 = vpack.c.bf16 %v430_v0, %v429_v62 }
 0x12f   : > { %v433_v7 = vpack.c.bf16 %v420_v3, %v419_v1  ;;  %v437_v8 = vpack.c.bf16 %v428_v4, %v427_v2 }
 0x130   : > { %443 = vst.msk [vmem:[#allocation2 + $0x18] sm:$0xff] %vm439_vm0, %v434_v5  ;;  %447 = vst.msk [vmem:[#allocation2 + $0x38] sm:$0xff] %vm439_vm0, %v438_v6 }
 0x131   : > { %442 = vst.msk [vmem:[#allocation2 + $0x10] sm:$0xff] %vm439_vm0, %v433_v7  ;;  %446 = vst.msk [vmem:[#allocation2 + $0x30] sm:$0xff] %vm439_vm0, %v437_v8 }
 0x132 PF: > { %p448_p3 = scmp.gt.s32.totalorder %s1649_s16, 0  ;;  %p449_p4 = scmp.lt.s32.totalorder %s1649_s16, 2 }
 0x134   : > { %p450_p6 = pnand %p449_p4, %p448_p3 }
 0x135   : > { %s1217_s19 = sadd.s32 (!%p450_p6), 4294967295, %s1649_s16  ;;  %v454_v9 = vld [vmem:[#allocation2] sm:$0xff] (!%p450_p6)  ;;  %vm482_vm1 = vcmask (!%p450_p6), 261120   ;;  %v455_v12 = vld [vmem:[#allocation2 + $0x8] sm:$0xff] (!%p450_p6)  ;;  %v1557_v19 = vld [vmem:[%s1902_s0 + $0x10] sm:$0xff] (!%p450_p6)   ;;  %s628_s14 = scalar_lea.vmem (!%p450_p6), %s1905_s3, %s1649_s16 }
 0x136   : > { %453 = sbr.rel (%p450_p6) target bundleno = 808 (0x328), region = 48  ;;  %s1264_s20 = sshll.u32 (!%p450_p6), %s1217_s19, 4  ;;  %1370 = vmatprep.mubr.msk.bf16.mxu0 (!%p450_p6), %vm482_vm1, %v454_v9  ;;  %v458_v15 = vld [vmem:[#allocation2 + $0x20] sm:$0xff] (!%p450_p6)  ;;  %v459_v16 = vld [vmem:[#allocation2 + $0x28] sm:$0xff] (!%p450_p6)  ;;  %1406 = vmatprep.mubr.bf16.mxu1 (!%p450_p6), %v1557_v19  ;;  %v1558_v45 = vld [vmem:[%s1902_s0 + $0x18] sm:$0xff] (!%p450_p6)  }
 0x137   : > { %s465_s21 = scalar_lea.vmem (!%p450_p6), [#allocation3], %s1264_s20  ;;  %v457_v14 = vld [vmem:[#allocation2 + $0x18] sm:$0xff] (!%p450_p6)  ;;  %v1561_v20 = vld [vmem:[%s1902_s0] sm:$0xff] (!%p450_p6)   ;;  %v1562_v46 = vld [vmem:[%s1902_s0 + $0x8] sm:$0xff] (!%p450_p6)  }
 0x138   : > { %v1555_v10 = vld [vmem:[%s465_s21] sm:$0xff] (!%p450_p6)   ;;  %v1556_v11 = vld [vmem:[%s465_s21 + $0x8] sm:$0xff] (!%p450_p6)   ;;  %v456_v13 = vld [vmem:[#allocation2 + $0x10] sm:$0xff] (!%p450_p6) }
 0x139   : > { %1366 = vmatprep.subr.bf16.mxu0 (!%p450_p6), %v1555_v10  ;;  %v460_v17 = vld [vmem:[#allocation2 + $0x30] sm:$0xff] (!%p450_p6)  ;;  %v461_v18 = vld [vmem:[#allocation2 + $0x38] sm:$0xff] (!%p450_p6)  ;;  %v1559_v47 = vld [vmem:[%s1902_s0 + $0x20] sm:$0xff] (!%p450_p6)  }
 0x13a   : > { %1367 = vmatpush3.bf16.msra.mxu0 (!%p450_p6), %v1555_v10  ;;  %v1560_v48 = vld [vmem:[%s1902_s0 + $0x28] sm:$0xff] (!%p450_p6)   ;;  %v1563_v49 = vld [vmem:[%s1902_s0 + $0x30] sm:$0xff] (!%p450_p6)   ;;  %v1564_v50 = vld [vmem:[%s1902_s0 + $0x38] sm:$0xff] (!%p450_p6)  }
 0x13b   : > { %1368 = vmatprep.subr.bf16.mxu0 (!%p450_p6), %v1556_v11  ;;  %v1230_v51 = vld [vmem:[%s628_s14] ss:$0 sm:$0xff] (!%p450_p6) }
 0x13e   : > { %1369 = vmatpush3.bf16.msra.mxu0 %v1556_v11 }
 0x141   : > { %1371 = vmatmul.mubr.msk.bf16.vlgmr.msra.gmra.mrb[0].mxu0 %vm482_vm1, %v455_v12 }
 0x142   : > { %1374 = vmatprep.mubr.msk.bf16.mxu0 %vm482_vm1, %v456_v13 }
 0x149   : > { %1375 = vmatmul.mubr.msk.bf16.gmra.mrb[4].mxu0 %vm482_vm1, %v457_v14 }
 0x14a   : > { %1378 = vmatprep.mubr.msk.bf16.mxu0 %vm482_vm1, %v458_v15 }
 0x151   : > { %1379 = vmatmul.mubr.msk.bf16.gmra.mrb[8].mxu0 %vm482_vm1, %v459_v16 }
 0x152   : > { %1382 = vmatprep.mubr.msk.bf16.mxu0 %vm482_vm1, %v460_v17 }
 0x159   : > { %1383 = vmatmul.mubr.msk.bf16.gmra.mrb[12].mxu0 %vm482_vm1, %v461_v18 }
 0x15a   : > { %1402 = vmatprep.mubr.bf16.mxu0 %v1561_v20 }
 0x214   : > { %v1372_v21 = vpop.f32.mrb[0].mxu0 }
 0x215   : > { %v541_v22 = vpop.f32.mrb[1].mxu0 }
 0x216   : > { %v1373_v23 = vpop.f32.mrb[2].mxu0 }
 0x217   : > { %v621_v24 = vpack.c.bf16 %v1373_v23, %v1372_v21  ;;  %v544_v25 = vpop.f32.mrb[3].mxu0 }
 0x218   : > { %v620_v26 = vpack.c.bf16 %v544_v25, %v541_v22 }
 0x21a   : > { %1386 = vmatprep.subr.bf16.mxu0 %v620_v26  ;;  %1486 = vmatprep.subr.bf16.mxu1 %v620_v26 }
 0x21b   : > { %1387 = vmatpush3.bf16.msra.mxu0 %v620_v26  ;;  %1494 = vmatpush3.bf16.msra.mxu1 %v620_v26 }
 0x21c   : > { %v1376_v27 = vpop.f32.mrb[4].mxu0  ;;  %1388 = vmatprep.subr.bf16.mxu0 %v621_v24  ;;  %1487 = vmatprep.subr.bf16.mxu1 %v621_v24 }
 0x21d   : > { %v557_v28 = vpop.f32.mrb[5].mxu0 }
 0x21e   : > { %v1377_v29 = vpop.f32.mrb[6].mxu0 }
 0x21f   : > { %v623_v30 = vpack.c.bf16 %v1377_v29, %v1376_v27  ;;  %v560_v31 = vpop.f32.mrb[7].mxu0  ;;  %1389 = vmatpush3.bf16.msra.mxu0 %v621_v24  ;;  %1495 = vmatpush3.bf16.msra.mxu1 %v621_v24 }
 0x220   : > { %v622_v32 = vpack.c.bf16 %v560_v31, %v557_v28 }
 0x222   : > { %1390 = vmatprep.subr.bf16.mxu0 %v622_v32  ;;  %1488 = vmatprep.subr.bf16.mxu1 %v622_v32 }
 0x223   : > { %1391 = vmatpush3.bf16.msra.mxu0 %v622_v32  ;;  %1496 = vmatpush3.bf16.msra.mxu1 %v622_v32 }
 0x224   : > { %v1380_v33 = vpop.f32.mrb[8].mxu0  ;;  %1392 = vmatprep.subr.bf16.mxu0 %v623_v30  ;;  %1489 = vmatprep.subr.bf16.mxu1 %v623_v30 }
 0x225   : > { %v573_v34 = vpop.f32.mrb[9].mxu0 }
 0x226   : > { %v1381_v35 = vpop.f32.mrb[10].mxu0 }
 0x227   : > { %v625_v36 = vpack.c.bf16 %v1381_v35, %v1380_v33  ;;  %v576_v37 = vpop.f32.mrb[11].mxu0  ;;  %1393 = vmatpush3.bf16.msra.mxu0 %v623_v30  ;;  %1497 = vmatpush3.bf16.msra.mxu1 %v623_v30 }
 0x228   : > { %v624_v38 = vpack.c.bf16 %v576_v37, %v573_v34 }
 0x22a   : > { %1394 = vmatprep.subr.bf16.mxu0 %v624_v38  ;;  %1490 = vmatprep.subr.bf16.mxu1 %v624_v38 }
 0x22b   : > { %1395 = vmatpush3.bf16.msra.mxu0 %v624_v38  ;;  %1498 = vmatpush3.bf16.msra.mxu1 %v624_v38 }
 0x22c   : > { %v1384_v39 = vpop.f32.mrb[12].mxu0  ;;  %1396 = vmatprep.subr.bf16.mxu0 %v625_v36  ;;  %1491 = vmatprep.subr.bf16.mxu1 %v625_v36 }
 0x22d   : > { %v589_v40 = vpop.f32.mrb[13].mxu0 }
 0x22e   : > { %v1385_v41 = vpop.f32.mrb[14].mxu0 }
 0x22f   : > { %v627_v42 = vpack.c.bf16 %v1385_v41, %v1384_v39  ;;  %v592_v43 = vpop.f32.mrb[15].mxu0  ;;  %1397 = vmatpush3.bf16.msra.mxu0 %v625_v36  ;;  %1499 = vmatpush3.bf16.msra.mxu1 %v625_v36 }
 0x230   : > { %v626_v44 = vpack.c.bf16 %v592_v43, %v589_v40 }
 0x232   : > { %1398 = vmatprep.subr.bf16.mxu0 %v626_v44  ;;  %1492 = vmatprep.subr.bf16.mxu1 %v626_v44 }
 0x233   : > { %1399 = vmatpush3.bf16.msra.mxu0 %v626_v44  ;;  %1500 = vmatpush3.bf16.msra.mxu1 %v626_v44 }
 0x234   : > { %1400 = vmatprep.subr.bf16.mxu0 %v627_v42  ;;  %1493 = vmatprep.subr.bf16.mxu1 %v627_v42 }
 0x237   : > { %1401 = vmatpush3.bf16.msra.mxu0 %v627_v42  ;;  %1501 = vmatpush3.bf16.msra.mxu1 %v627_v42 }
 0x23a   : > { %1407 = vmatmul.mubr.bf16.vlgmr.msra.gmra.mrb[0].mxu1 %v1558_v45  ;;  %1403 = vmatmul.mubr.bf16.vlgmr.msra.gmra.mrb[16].mxu0 %v1562_v46 }
 0x23b   : > { %1410 = vmatprep.mubr.bf16.mxu1 %v1559_v47 }
 0x242   : > { %1411 = vmatmul.mubr.bf16.gmra.mrb[4].mxu1 %v1560_v48 }
 0x243   : > { %1414 = vmatprep.mubr.bf16.mxu1 %v1563_v49 }
 0x24a   : > { %1415 = vmatmul.mubr.bf16.gmra.mrb[8].mxu1 %v1564_v50 }
 0x30d   : > { %v1408_v52 = vpop.f32.mrb[0].mxu1  ;;  %v1404_v53 = vpop.f32.mrb[16].mxu0 }
 0x30e   : > { %v743_v54 = vadd.f32 %v1408_v52, %v1230_v51  ;;  %v734_v55 = vpop.f32.mrb[1].mxu1  ;;  %v727_v56 = vadd.f32 %v1404_v53, %v1230_v51  ;;  %v718_v57 = vpop.f32.mrb[17].mxu0 }
 0x30f   : > { %v735_v58 = vadd.f32 %v1230_v51, %v734_v55  ;;  %v1409_v59 = vpop.f32.mrb[2].mxu1  ;;  %v719_v60 = vadd.f32 %v1230_v51, %v718_v57  ;;  %v1405_v61 = vpop.f32.mrb[18].mxu0 }
 0x310   : > { %v746_v62 = vadd.f32 %v1409_v59, %v1230_v51  ;;  %v737_v63 = vpop.f32.mrb[3].mxu1  ;;  %v783_v0 = vmax.f32 %v727_v56, 0.0  ;;  %v730_v1 = vadd.f32 %v1405_v61, %v1230_v51  ;;  %v721_v2 = vpop.f32.mrb[19].mxu0  ;;  %v787_v6 = vmax.f32 %v743_v54, 0.0 }
 0x311   : > { %v738_v3 = vadd.f32 %v1230_v51, %v737_v63  ;;  %v781_v4 = vmax.f32 %v719_v60, 0.0  ;;  %v722_v5 = vadd.f32 %v1230_v51, %v721_v2  ;;  %v785_v9 = vmax.f32 %v735_v58, 0.0 }
 0x312   : > { %v788_v7 = vmax.f32 %v746_v62, 0.0  ;;  %v784_v8 = vmax.f32 %v730_v1, 0.0 }
 0x313   : > { %v786_v10 = vmax.f32 %v738_v3, 0.0  ;;  %v782_v11 = vmax.f32 %v722_v5, 0.0 }
 0x314   : > { %v800_v12 = vpack.c.bf16 %v788_v7, %v787_v6  ;;  %v798_v13 = vpack.c.bf16 %v784_v8, %v783_v0 }
 0x315   : > { %v799_v14 = vpack.c.bf16 %v786_v10, %v785_v9  ;;  %v1412_v15 = vpop.f32.mrb[4].mxu1  ;;  %v797_v16 = vpack.c.bf16 %v782_v11, %v781_v4 }
 0x316   : > { %808 = vst.msk [vmem:[#allocation2 + $0x18] sm:$0xff] %vm482_vm1, %v800_v12  ;;  %v759_v17 = vadd.f32 %v1412_v15, %v1230_v51  ;;  %v750_v18 = vpop.f32.mrb[5].mxu1  ;;  %806 = vst.msk [vmem:[#allocation2 + $0x8] sm:$0xff] %vm482_vm1, %v798_v13 }
 0x317   : > { %807 = vst.msk [vmem:[#allocation2 + $0x10] sm:$0xff] %vm482_vm1, %v799_v14  ;;  %v751_v19 = vadd.f32 %v1230_v51, %v750_v18  ;;  %v1413_v20 = vpop.f32.mrb[6].mxu1  ;;  %805 = vst.msk [vmem:[#allocation2] sm:$0xff] %vm482_vm1, %v797_v16 }
 0x318   : > { %v762_v21 = vadd.f32 %v1413_v20, %v1230_v51  ;;  %v753_v22 = vpop.f32.mrb[7].mxu1  ;;  %v791_v24 = vmax.f32 %v759_v17, 0.0 }
 0x319   : > { %v754_v23 = vadd.f32 %v1230_v51, %v753_v22  ;;  %v789_v26 = vmax.f32 %v751_v19, 0.0 }
 0x31a   : > { %v792_v25 = vmax.f32 %v762_v21, 0.0 }
 0x31b   : > { %v790_v27 = vmax.f32 %v754_v23, 0.0 }
 0x31c   : > { %v802_v28 = vpack.c.bf16 %v792_v25, %v791_v24 }
 0x31d   : > { %v801_v29 = vpack.c.bf16 %v790_v27, %v789_v26  ;;  %v1416_v30 = vpop.f32.mrb[8].mxu1 }
 0x31e   : > { %810 = vst.msk [vmem:[#allocation2 + $0x28] sm:$0xff] %vm482_vm1, %v802_v28  ;;  %v775_v31 = vadd.f32 %v1416_v30, %v1230_v51  ;;  %v766_v32 = vpop.f32.mrb[9].mxu1 }
 0x31f   : > { %809 = vst.msk [vmem:[#allocation2 + $0x20] sm:$0xff] %vm482_vm1, %v801_v29  ;;  %v767_v33 = vadd.f32 %v1230_v51, %v766_v32  ;;  %v1417_v34 = vpop.f32.mrb[10].mxu1 }
 0x320   : > { %v778_v35 = vadd.f32 %v1417_v34, %v1230_v51  ;;  %v769_v36 = vpop.f32.mrb[11].mxu1  ;;  %v795_v38 = vmax.f32 %v775_v31, 0.0 }
 0x321   : > { %v770_v37 = vadd.f32 %v1230_v51, %v769_v36  ;;  %v793_v40 = vmax.f32 %v767_v33, 0.0 }
 0x322   : > { %v796_v39 = vmax.f32 %v778_v35, 0.0 }
 0x323   : > { %v794_v41 = vmax.f32 %v770_v37, 0.0 }
 0x324   : > { %v804_v42 = vpack.c.bf16 %v796_v39, %v795_v38 }
 0x325   : > { %v803_v43 = vpack.c.bf16 %v794_v41, %v793_v40 }
 0x326   : > { %812 = vst.msk [vmem:[#allocation2 + $0x38] sm:$0xff] %vm482_vm1, %v804_v42 }
 0x327   : > { %811 = vst.msk [vmem:[#allocation2 + $0x30] sm:$0xff] %vm482_vm1, %v803_v43 }
 0x328 PF: > { %p1239_p10 = scmp.ne.s32.totalorder %s1649_s16, 2 }
 0x329   : > { %s1240_s17 = sadd.s32 (!%p1239_p10), 4294967295, %s1649_s16  ;;  %v817_v44 = vld [vmem:[#allocation2] sm:$0xff] (!%p1239_p10)  ;;  %vm845_vm2 = vcmask (!%p1239_p10), 261120   ;;  %v818_v47 = vld [vmem:[#allocation2 + $0x8] sm:$0xff] (!%p1239_p10)  ;;  %v819_v48 = vld [vmem:[#allocation2 + $0x10] sm:$0xff] (!%p1239_p10)  ;;  %s991_s12 = scalar_lea.vmem (!%p1239_p10), %s1905_s3, %s1649_s16 }
 0x32a   : > { %816 = sbr.rel (%p1239_p10) target bundleno = 1304 (0x518), region = 52  ;;  %s1265_s18 = sshll.u32 (!%p1239_p10), %s1240_s17, 4  ;;  %1422 = vmatprep.mubr.msk.bf16.mxu0 (!%p1239_p10), %vm845_vm2, %v817_v44  ;;  %v820_v49 = vld [vmem:[#allocation2 + $0x18] sm:$0xff] (!%p1239_p10)  ;;  %v821_v50 = vld [vmem:[#allocation2 + $0x20] sm:$0xff] (!%p1239_p10)  ;;  %v822_v51 = vld [vmem:[#allocation2 + $0x28] sm:$0xff] (!%p1239_p10) }
 0x32b   : > { %s828_s19 = scalar_lea.vmem (!%p1239_p10), [#allocation3], %s1265_s18  ;;  %v1567_v54 = vld [vmem:[%s1902_s0 + $0x10] sm:$0xff] (!%p1239_p10)   ;;  %v1571_v55 = vld [vmem:[%s1902_s0] sm:$0xff] (!%p1239_p10)   ;;  %v1568_v16 = vld [vmem:[%s1902_s0 + $0x18] sm:$0xff] (!%p1239_p10)  }
 0x32c   : > { %v1565_v45 = vld [vmem:[%s828_s19] sm:$0xff] (!%p1239_p10)   ;;  %v1566_v46 = vld [vmem:[%s828_s19 + $0x8] sm:$0xff] (!%p1239_p10)   ;;  %1458 = vmatprep.mubr.bf16.mxu1 (!%p1239_p10), %v1567_v54  ;;  %v1573_v20 = vld [vmem:[%s1902_s0 + $0x30] sm:$0xff] (!%p1239_p10)  }
 0x32d   : > { %1418 = vmatprep.subr.bf16.mxu0 (!%p1239_p10), %v1565_v45  ;;  %v824_v53 = vld [vmem:[#allocation2 + $0x38] sm:$0xff] (!%p1239_p10)  ;;  %v1572_v17 = vld [vmem:[%s1902_s0 + $0x8] sm:$0xff] (!%p1239_p10)   ;;  %v1569_v18 = vld [vmem:[%s1902_s0 + $0x20] sm:$0xff] (!%p1239_p10)  }
 0x32e   : > { %1419 = vmatpush3.bf16.msra.mxu0 (!%p1239_p10), %v1565_v45  ;;  %v823_v52 = vld [vmem:[#allocation2 + $0x30] sm:$0xff] (!%p1239_p10)  ;;  %v1570_v19 = vld [vmem:[%s1902_s0 + $0x28] sm:$0xff] (!%p1239_p10)   ;;  %v1574_v21 = vld [vmem:[%s1902_s0 + $0x38] sm:$0xff] (!%p1239_p10)  }
 0x32f   : > { %1420 = vmatprep.subr.bf16.mxu0 (!%p1239_p10), %v1566_v46  ;;  %v1253_v22 = vld [vmem:[%s991_s12] ss:$0 sm:$0xff] (!%p1239_p10) }
 0x332   : > { %1421 = vmatpush3.bf16.msra.mxu0 %v1566_v46 }
 0x335   : > { %1423 = vmatmul.mubr.msk.bf16.vlgmr.msra.gmra.mrb[0].mxu0 %vm845_vm2, %v818_v47 }
 0x336   : > { %1426 = vmatprep.mubr.msk.bf16.mxu0 %vm845_vm2, %v819_v48 }
 0x33d   : > { %1427 = vmatmul.mubr.msk.bf16.gmra.mrb[4].mxu0 %vm845_vm2, %v820_v49 }
 0x33e   : > { %1430 = vmatprep.mubr.msk.bf16.mxu0 %vm845_vm2, %v821_v50 }
 0x345   : > { %1431 = vmatmul.mubr.msk.bf16.gmra.mrb[8].mxu0 %vm845_vm2, %v822_v51 }
 0x346   : > { %1434 = vmatprep.mubr.msk.bf16.mxu0 %vm845_vm2, %v823_v52 }
 0x34d   : > { %1435 = vmatmul.mubr.msk.bf16.gmra.mrb[12].mxu0 %vm845_vm2, %v824_v53 }
 0x34e   : > { %1454 = vmatprep.mubr.bf16.mxu0 %v1571_v55 }
 0x408   : > { %v1424_v56 = vpop.f32.mrb[0].mxu0 }
 0x409   : > { %v904_v57 = vpop.f32.mrb[1].mxu0 }
 0x40a   : > { %v1425_v58 = vpop.f32.mrb[2].mxu0 }
 0x40b   : > { %v984_v59 = vpack.c.bf16 %v1425_v58, %v1424_v56  ;;  %v907_v60 = vpop.f32.mrb[3].mxu0 }
 0x40c   : > { %v983_v61 = vpack.c.bf16 %v907_v60, %v904_v57 }
 0x40e   : > { %1438 = vmatprep.subr.bf16.mxu0 %v983_v61  ;;  %1502 = vmatprep.subr.bf16.mxu1 %v983_v61 }
 0x40f   : > { %1439 = vmatpush3.bf16.msra.mxu0 %v983_v61  ;;  %1510 = vmatpush3.bf16.msra.mxu1 %v983_v61 }
 0x410   : > { %v1428_v62 = vpop.f32.mrb[4].mxu0  ;;  %1440 = vmatprep.subr.bf16.mxu0 %v984_v59  ;;  %1503 = vmatprep.subr.bf16.mxu1 %v984_v59 }
 0x411   : > { %v920_v63 = vpop.f32.mrb[5].mxu0 }
 0x412   : > { %v1429_v0 = vpop.f32.mrb[6].mxu0 }
 0x413   : > { %v986_v1 = vpack.c.bf16 %v1429_v0, %v1428_v62  ;;  %v923_v2 = vpop.f32.mrb[7].mxu0  ;;  %1441 = vmatpush3.bf16.msra.mxu0 %v984_v59  ;;  %1511 = vmatpush3.bf16.msra.mxu1 %v984_v59 }
 0x414   : > { %v985_v3 = vpack.c.bf16 %v923_v2, %v920_v63 }
 0x416   : > { %1442 = vmatprep.subr.bf16.mxu0 %v985_v3  ;;  %1504 = vmatprep.subr.bf16.mxu1 %v985_v3 }
 0x417   : > { %1443 = vmatpush3.bf16.msra.mxu0 %v985_v3  ;;  %1512 = vmatpush3.bf16.msra.mxu1 %v985_v3 }
 0x418   : > { %v1432_v4 = vpop.f32.mrb[8].mxu0  ;;  %1444 = vmatprep.subr.bf16.mxu0 %v986_v1  ;;  %1505 = vmatprep.subr.bf16.mxu1 %v986_v1 }
 0x419   : > { %v936_v5 = vpop.f32.mrb[9].mxu0 }
 0x41a   : > { %v1433_v6 = vpop.f32.mrb[10].mxu0 }
 0x41b   : > { %v988_v7 = vpack.c.bf16 %v1433_v6, %v1432_v4  ;;  %v939_v8 = vpop.f32.mrb[11].mxu0  ;;  %1445 = vmatpush3.bf16.msra.mxu0 %v986_v1  ;;  %1513 = vmatpush3.bf16.msra.mxu1 %v986_v1 }
 0x41c   : > { %v987_v9 = vpack.c.bf16 %v939_v8, %v936_v5 }
 0x41e   : > { %1446 = vmatprep.subr.bf16.mxu0 %v987_v9  ;;  %1506 = vmatprep.subr.bf16.mxu1 %v987_v9 }
 0x41f   : > { %1447 = vmatpush3.bf16.msra.mxu0 %v987_v9  ;;  %1514 = vmatpush3.bf16.msra.mxu1 %v987_v9 }
 0x420   : > { %v1436_v10 = vpop.f32.mrb[12].mxu0  ;;  %1448 = vmatprep.subr.bf16.mxu0 %v988_v7  ;;  %1507 = vmatprep.subr.bf16.mxu1 %v988_v7 }
 0x421   : > { %v952_v11 = vpop.f32.mrb[13].mxu0 }
 0x422   : > { %v1437_v12 = vpop.f32.mrb[14].mxu0 }
 0x423   : > { %v990_v13 = vpack.c.bf16 %v1437_v12, %v1436_v10  ;;  %v955_v14 = vpop.f32.mrb[15].mxu0  ;;  %1449 = vmatpush3.bf16.msra.mxu0 %v988_v7  ;;  %1515 = vmatpush3.bf16.msra.mxu1 %v988_v7 }
 0x424   : > { %v989_v15 = vpack.c.bf16 %v955_v14, %v952_v11 }
 0x426   : > { %1450 = vmatprep.subr.bf16.mxu0 %v989_v15  ;;  %1508 = vmatprep.subr.bf16.mxu1 %v989_v15 }
 0x427   : > { %1451 = vmatpush3.bf16.msra.mxu0 %v989_v15  ;;  %1516 = vmatpush3.bf16.msra.mxu1 %v989_v15 }
 0x428   : > { %1452 = vmatprep.subr.bf16.mxu0 %v990_v13  ;;  %1509 = vmatprep.subr.bf16.mxu1 %v990_v13 }
 0x42b   : > { %1453 = vmatpush3.bf16.msra.mxu0 %v990_v13  ;;  %1517 = vmatpush3.bf16.msra.mxu1 %v990_v13 }
 0x42e   : > { %1459 = vmatmul.mubr.bf16.vlgmr.msra.gmra.mrb[0].mxu1 %v1568_v16  ;;  %1455 = vmatmul.mubr.bf16.vlgmr.msra.gmra.mrb[16].mxu0 %v1572_v17 }
 0x42f   : > { %1462 = vmatprep.mubr.bf16.mxu1 %v1569_v18 }
 0x436   : > { %1463 = vmatmul.mubr.bf16.gmra.mrb[4].mxu1 %v1570_v19 }
 0x437   : > { %1466 = vmatprep.mubr.bf16.mxu1 %v1573_v20 }
 0x43e   : > { %1467 = vmatmul.mubr.bf16.gmra.mrb[8].mxu1 %v1574_v21 }
 0x501   : > { %v1460_v23 = vpop.f32.mrb[0].mxu1  ;;  %v1456_v24 = vpop.f32.mrb[16].mxu0 }
 0x502   : > { %v1106_v25 = vadd.f32 %v1460_v23, %v1253_v22  ;;  %v1097_v26 = vpop.f32.mrb[1].mxu1  ;;  %v1090_v27 = vadd.f32 %v1456_v24, %v1253_v22  ;;  %v1081_v28 = vpop.f32.mrb[17].mxu0 }
 0x503   : > { %v1098_v29 = vadd.f32 %v1253_v22, %v1097_v26  ;;  %v1461_v30 = vpop.f32.mrb[2].mxu1  ;;  %v1082_v31 = vadd.f32 %v1253_v22, %v1081_v28  ;;  %v1457_v32 = vpop.f32.mrb[18].mxu0 }
 0x504   : > { %1150 = vst.msk [vmem:[%s1906_s4 + $0x30] sm:$0xff] %vm845_vm2, %v1106_v25  ;;  %v1109_v33 = vadd.f32 %v1461_v30, %v1253_v22  ;;  %v1100_v34 = vpop.f32.mrb[3].mxu1  ;;  %1146 = vst.msk [vmem:[%s1906_s4 + $0x10] sm:$0xff] %vm845_vm2, %v1090_v27  ;;  %v1093_v35 = vadd.f32 %v1457_v32, %v1253_v22  ;;  %v1084_v36 = vpop.f32.mrb[19].mxu0 }
 0x505   : > { %1148 = vst.msk [vmem:[%s1906_s4 + $0x20] sm:$0xff] %vm845_vm2, %v1098_v29  ;;  %v1101_v37 = vadd.f32 %v1253_v22, %v1100_v34  ;;  %1144 = vst.msk [vmem:[%s1906_s4] sm:$0xff] %vm845_vm2, %v1082_v31  ;;  %v1085_v38 = vadd.f32 %v1253_v22, %v1084_v36 }
 0x506   : > { %1151 = vst.msk [vmem:[%s1906_s4 + $0x38] sm:$0xff] %vm845_vm2, %v1109_v33  ;;  %1147 = vst.msk [vmem:[%s1906_s4 + $0x18] sm:$0xff] %vm845_vm2, %v1093_v35 }
 0x507   : > { %1149 = vst.msk [vmem:[%s1906_s4 + $0x28] sm:$0xff] %vm845_vm2, %v1101_v37  ;;  %1145 = vst.msk [vmem:[%s1906_s4 + $0x8] sm:$0xff] %vm845_vm2, %v1085_v38 }
 0x509   : > { %v1464_v39 = vpop.f32.mrb[4].mxu1 }
 0x50a   : > { %v1122_v40 = vadd.f32 %v1464_v39, %v1253_v22  ;;  %v1113_v41 = vpop.f32.mrb[5].mxu1 }
 0x50b   : > { %v1114_v42 = vadd.f32 %v1253_v22, %v1113_v41  ;;  %v1465_v43 = vpop.f32.mrb[6].mxu1 }
 0x50c   : > { %1154 = vst.msk [vmem:[%s1906_s4 + $0x50] sm:$0xff] %vm845_vm2, %v1122_v40  ;;  %v1125_v44 = vadd.f32 %v1465_v43, %v1253_v22  ;;  %v1116_v45 = vpop.f32.mrb[7].mxu1 }
 0x50d   : > { %1152 = vst.msk [vmem:[%s1906_s4 + $0x40] sm:$0xff] %vm845_vm2, %v1114_v42  ;;  %v1117_v46 = vadd.f32 %v1253_v22, %v1116_v45 }
 0x50e   : > { %1155 = vst.msk [vmem:[%s1906_s4 + $0x58] sm:$0xff] %vm845_vm2, %v1125_v44 }
 0x50f   : > { %1153 = vst.msk [vmem:[%s1906_s4 + $0x48] sm:$0xff] %vm845_vm2, %v1117_v46 }
 0x511   : > { %v1468_v47 = vpop.f32.mrb[8].mxu1 }
 0x512   : > { %v1138_v48 = vadd.f32 %v1468_v47, %v1253_v22  ;;  %v1129_v49 = vpop.f32.mrb[9].mxu1 }
 0x513   : > { %v1130_v50 = vadd.f32 %v1253_v22, %v1129_v49  ;;  %v1469_v51 = vpop.f32.mrb[10].mxu1 }
 0x514   : > { %1158 = vst.msk [vmem:[%s1906_s4 + $0x70] sm:$0xff] %vm845_vm2, %v1138_v48  ;;  %v1141_v52 = vadd.f32 %v1469_v51, %v1253_v22  ;;  %v1132_v53 = vpop.f32.mrb[11].mxu1 }
 0x515   : > { %1156 = vst.msk [vmem:[%s1906_s4 + $0x60] sm:$0xff] %vm845_vm2, %v1130_v50  ;;  %v1133_v54 = vadd.f32 %v1253_v22, %v1132_v53 }
 0x516   : > { %1159 = vst.msk [vmem:[%s1906_s4 + $0x78] sm:$0xff] %vm845_vm2, %v1141_v52 }
 0x517   : > { %1157 = vst.msk [vmem:[%s1906_s4 + $0x68] sm:$0xff] %vm845_vm2, %v1133_v54 }
 0x518 PF: > { %s15_s15 = sadd.s32 1, %s1613_s15  }
 0x519   : > { %p12_p11 = scmp.ge.s32.totalorder %s15_s15, 5  }
 0x51b   :  { %14 = sbr.rel (!%p12_p11) target bundleno = 1 (0x1), region = 80 }
 0x522   :  { %1171 = vsyncpa [#allocation4], 1 }
 0x523   :  { %1173 = vsyncpa [#allocation4 + $0x1], 1 }

</bundles_post_ra>
